<compile_context>
chip_gen: v7x
topology: tpu7x:2x2x1
jax: 0.10.0
libtpu: 0.0.40
codegen_flags: <defaults>
</compile_context>

<pallas_src>
import jax
import jax.numpy as jnp
from jax.experimental import pallas as pl
from jax.experimental.pallas import tpu as pltpu


def critic_kernel(x_ref, w1_ref, b1_ref, w2_ref, b2_ref, o_ref):
    # Layer 1: x @ W1 + b1  (bf16 feeds, f32 accumulation on the MXU).
    h = jnp.dot(x_ref[...], w1_ref[...], preferred_element_type=jnp.float32)
    h = h + b1_ref[...]
    # ReLU on the VPU.
    h = jnp.maximum(h, 0.0)
    # Layer 2 (H -> 1): broadcast-multiply by the [1, H] weight row and reduce
    # over lanes; avoids an N=1 MXU matmul and its padded [H, 1] weight tile.
    q = jnp.sum(h * w2_ref[...], axis=-1, keepdims=True)
    # Scalar bias from SMEM rides the free scalar slot.
    q = q + b2_ref[0, 0]
    o_ref[...] = q.astype(o_ref.dtype)


def prepare_params(w1, b1, w2, b2):
    """One-time parameter preprocessing (hoisted out of the per-step path).

    w1: [Din, H], b1: [H] or [1, H], w2: [H, 1], b2: [1] or [1, 1].
    """
    return {
        "w1": jnp.asarray(w1, jnp.bfloat16),                      # MXU feed
        "b1": jnp.asarray(b1, jnp.float32).reshape(1, -1),        # [1, H]
        "w2_row": jnp.asarray(w2, jnp.float32).reshape(1, -1),    # [1, H] lane-major
        "b2": jnp.asarray(b2, jnp.float32).reshape(1, 1),         # SMEM scalar
    }


@jax.jit
def critic_forward(state, action, params):
    """state: [B, Ds], action: [B, Da] -> Q: [B, 1] (float32)."""
    # Concat + bf16 cast fused by XLA around the pallas_call.
    x = jnp.concatenate([state, action], axis=1).astype(jnp.bfloat16)
    B = x.shape[0]

    vmem = pl.BlockSpec(memory_space=pltpu.MemorySpace.VMEM)
    smem = pl.BlockSpec(memory_space=pltpu.MemorySpace.SMEM)

    # TODO(synk): if B grows to production DDPG batch sizes (>~512), switch to
    # a batch grid: grid=(pl.cdiv(B, TILE_B),), tiled x/out BlockSpecs, resident
    # weights, dimension_semantics=("parallel",) so v7x's second TC is used,
    # and a lane-dense output slab reshaped to [B, 1] in the wrapper.
    return pl.pallas_call(
        critic_kernel,
        out_shape=jax.ShapeDtypeStruct((B, 1), jnp.float32),
        in_specs=[vmem, vmem, vmem, vmem, smem],
        out_specs=vmem,
    )(x, params["w1"], params["b1"], params["w2_row"], params["b2"])


def _torch_linear_init(key, fan_in, shape):
    # Matches PyTorch nn.Linear default: U(-1/sqrt(fan_in), 1/sqrt(fan_in)).
    bound = 1.0 / jnp.sqrt(jnp.float32(fan_in))
    return jax.random.uniform(key, shape, jnp.float32, -bound, bound)


if __name__ == "__main__":
    key = jax.random.PRNGKey(0)
    k_s, k_a, k_w1, k_b1, k_w2, k_b2 = jax.random.split(key, 6)

    B = 8          # batch
    Ds = 24        # state dim
    Da = 8         # action dim
    input_size = Ds + Da   # 32
    hidden_size = 32

    state = jax.random.normal(k_s, (B, Ds), jnp.float32)
    action = jax.random.normal(k_a, (B, Da), jnp.float32)

    # Parameters stored as [in, out] (transposed relative to torch's [out, in]).
    w1 = _torch_linear_init(k_w1, input_size, (input_size, hidden_size))
    b1 = _torch_linear_init(k_b1, input_size, (hidden_size,))
    w2 = _torch_linear_init(k_w2, hidden_size, (hidden_size, 1))
    b2 = _torch_linear_init(k_b2, hidden_size, (1,))

    params = prepare_params(w1, b1, w2, b2)

    out = jax.block_until_ready(critic_forward(state, action, params))

    # Pure-JAX f32 reference (kernel uses bf16 feeds -> loose tolerance).
    x = jnp.concatenate([state, action], axis=1)
    ref = jnp.maximum(x @ w1 + b1, 0.0) @ w2 + b2
    assert out.shape == (B, 1)
    assert jnp.allclose(out, ref, atol=2e-2, rtol=2e-2), (out, ref)

    print("KERNEL_OK")
</pallas_src>

<mosaic_0001>
module attributes {stable_mosaic.version = 11 : i64} {
  func.func @critic_kernel(%arg0: memref<8x32xbf16, #tpu.memory_space<vmem>>, %arg1: memref<32x32xbf16, #tpu.memory_space<vmem>>, %arg2: memref<1x32xf32, #tpu.memory_space<vmem>>, %arg3: memref<1x32xf32, #tpu.memory_space<vmem>>, %arg4: memref<1x1xf32, #tpu.memory_space<smem>>, %arg5: memref<8x1xf32, #tpu.memory_space<vmem>>) attributes {dimension_semantics = [], scalar_prefetch = 0 : i64, scratch_operands = 0 : i64, tpu.core_type = #tpu.core_type<tc>} {
    %c0 = arith.constant 0 : index
    %c0_0 = arith.constant 0 : index
    %0 = vector.load %arg0[%c0, %c0_0] : memref<8x32xbf16, #tpu.memory_space<vmem>>, vector<8x32xbf16>
    %c0_1 = arith.constant 0 : index
    %c0_2 = arith.constant 0 : index
    %1 = vector.load %arg1[%c0_1, %c0_2] : memref<32x32xbf16, #tpu.memory_space<vmem>>, vector<32x32xbf16>
    %cst = arith.constant dense<0.000000e+00> : vector<8x32xf32>
    %2 = tpu.matmul %0, %1, %cst {dimension_numbers = #tpu.dot_dimension_numbers<[1], [0], [0], [1], [0, 0, 1, 1], [], []>} : vector<8x32xbf16>, vector<32x32xbf16>, vector<8x32xf32> -> vector<8x32xf32>
    %c0_3 = arith.constant 0 : index
    %c0_4 = arith.constant 0 : index
    %3 = vector.load %arg2[%c0_3, %c0_4] : memref<1x32xf32, #tpu.memory_space<vmem>>, vector<1x32xf32>
    %4 = vector.broadcast %3 : vector<1x32xf32> to vector<8x32xf32>
    %5 = arith.addf %2, %4 : vector<8x32xf32>
    %cst_5 = arith.constant 0.000000e+00 : f32
    %6 = vector.broadcast %cst_5 : f32 to vector<8x32xf32>
    %7 = arith.maximumf %5, %6 : vector<8x32xf32>
    %c0_6 = arith.constant 0 : index
    %c0_7 = arith.constant 0 : index
    %8 = vector.load %arg3[%c0_6, %c0_7] : memref<1x32xf32, #tpu.memory_space<vmem>>, vector<1x32xf32>
    %9 = vector.broadcast %8 : vector<1x32xf32> to vector<8x32xf32>
    %10 = arith.mulf %7, %9 : vector<8x32xf32>
    %cst_8 = arith.constant dense<0.000000e+00> : vector<8xf32>
    %11 = vector.multi_reduction <add>, %10, %cst_8 [1] : vector<8x32xf32> to vector<8xf32>
    %12 = vector.shape_cast %11 : vector<8xf32> to vector<8x1xf32>
    %c0_9 = arith.constant 0 : index
    %c0_10 = arith.constant 0 : index
    %13 = memref.load %arg4[%c0_9, %c0_10] : memref<1x1xf32, #tpu.memory_space<smem>>
    %14 = vector.broadcast %13 : f32 to vector<8x1xf32>
    %15 = arith.addf %12, %14 : vector<8x1xf32>
    %c0_11 = arith.constant 0 : index
    %c0_12 = arith.constant 0 : index
    %16 = vector.load %arg5[%c0_11, %c0_12] : memref<8x1xf32, #tpu.memory_space<vmem>>, vector<8x1xf32>
    tpu.vector_store %arg5[%c0_11, %c0_12], %15 {strides = array<i32>} : memref<8x1xf32, #tpu.memory_space<vmem>>, vector<8x1xf32>,
    return
  }
}

</mosaic_0001>

<bundles_post_ra>
// kernel: critic_forward.1
= control target key start
LH: loop header
LB: loop body
LE: loop exit
PB: predicated region body
PF: predicated region fallthrough
CT: control target
= control target key end

     0   :  { %v131_v0 = vmov 0.0   ;;  %vm132_vm0 = vmmov 0   ;;  %vm46_vm1 = vcmask 261120   ;;  %vm105_vm2 = vcmask 7168   ;;  %s184_s1 = inlined_call_operand.vmem [shape: bf16[32,32], index: 1, kind: input, shape index: {}]   ;;  %s185_s0 = inlined_call_operand.vmem [shape: bf16[8,32], index: 0, kind: input, shape index: {}]   ;;  %s186_s2 = inlined_call_operand.vmem [shape: f32[1,32], index: 2, kind: input, shape index: {}]   ;;  %s187_s3 = inlined_call_operand.vmem [shape: f32[1,32], index: 3, kind: input, shape index: {}]   ;;  %s188_s4 = inlined_call_operand.<no memory space> [shape: f32[1,1], index: 4, kind: input, shape index: {}]   ;;  %s189_s5 = inlined_call_operand.vmem [shape: f32[8,1], index: 5, kind: output, shape index: {}]  }
   0x1   :  { %119 = vmatprep.subr.bf16.mxu0 %v131_v0  ;;  %v129_v1 = vld [vmem:[%s184_s1] sm:$0xff]   ;;  %123 = vmatprep.mubr.msk.bf16.mxu0 %vm132_vm0, %v131_v0  ;;  %v130_v2 = vld [vmem:[%s184_s1 + $0x8] sm:$0xff]   ;;  %v103_v14 = vstv %s188_s4 }
   0x2   :  { %120 = vmatpush3.bf16.msra.mxu0 %v129_v1  ;;  %v22_v3 = vld [vmem:[%s185_s0] sm:$0xf] }
   0x3   :  { %121 = vmatprep.subr.bf16.mxu0 %v131_v0  ;;  %v111_v4 = vld [vmem:[%s186_s2] ss:$0 sm:$0xff] }
   0x4   :  { %v115_v9 = vld [vmem:[%s187_s3] ss:$0 sm:$0xff] }
   0x6   :  { %122 = vmatpush3.bf16.msra.mxu0 %v130_v2 }
   0x9   :  { %124 = vmatmul.mubr.msk.bf16.vlgmr.msra.gmra.mrb[0].mxu0 %vm46_vm1, %v22_v3 }
  0xdc   :  { %v84_v5 = vpop.f32.mrb[0].mxu0 }
  0xdd   :  { %v85_v6 = vadd.f32 %v111_v4, %v84_v5  ;;  %v125_v7 = vpop.f32.mrb[1].mxu0 }
  0xde   :  { %v87_v8 = vpop.f32.mrb[2].mxu0 }
  0xdf   :  { %v90_v10 = vmax.f32 %v85_v6, 0.0  ;;  %v126_v11 = vpop.f32.mrb[3].mxu0 }
  0xe1   :  { %v98_v12 = vmul.f32 %v115_v9, %v90_v10 }
  0xe3   :  { %v99_v13 = vsel %vm46_vm1, %v98_v12, 0.0 }
  0xe4   :  { %100 = vadd.xlane.f32.xlu0 %v99_v13 }
 0x171   :  { %v101_v15 = vpop.xlane.xlu0 %100 }
 0x172   :  { %v104_v16 = vadd.f32 %v103_v14, %v101_v15 }
 0x174   :  { %106 = vst.msk [vmem:[%s189_s5] sm:$0xff] %vm105_vm2, %v104_v16 }

</bundles_post_ra>
